<compile_context>
chip_gen: v5e
topology: v5e:2x2
jax: 0.10.0
libtpu: 0.0.40
codegen_flags: <defaults>
</compile_context>

<pallas_src>
import jax
import jax.numpy as jnp
from jax.experimental import pallas as pl
from jax.experimental.pallas import tpu as pltpu

LANES = 128        # vreg lane width
TILE_ROWS = 4096   # 4096 x 128 f32 = 2 MiB/buffer; ~8 MiB double-buffered in+out


def linreg_kernel(w_ref, b_ref, x_ref, o_ref):
    # w_ref / b_ref: (1, 1) f32 scalars in SMEM.
    # x_ref / o_ref: (tile_rows, 128) tiles in VMEM (f32 or bf16).
    w = w_ref[0, 0]
    b = b_ref[0, 0]
    x = x_ref[...].astype(jnp.float32)               # no-op for f32, in-vreg for bf16
    o_ref[...] = (x * w + b).astype(o_ref.dtype)     # single VPU FMA per vreg


def linear_regression_forward(x, weight, bias, *, tile_rows=TILE_ROWS):
    """Equivalent of nn.Linear(1, 1): x (..., 1) -> (..., 1), dtype-preserving.

    For best end-to-end performance wrap the caller in jax.jit so the small
    plain-JAX pre/post ops fuse with neighbouring computation.
    """
    orig_shape = x.shape

    # Native compute/storage dtypes (kept as-is in HBM, upcast to f32 in-vreg).
    if x.dtype in (jnp.float32, jnp.bfloat16):
        out_dtype = x.dtype
    else:
        x = x.astype(jnp.float32)
        out_dtype = jnp.float32
    sub = 16 if out_dtype == jnp.bfloat16 else 8     # min sublane tiling for dtype

    w_smem = jnp.asarray(weight, jnp.float32).reshape(1, 1)
    b_smem = jnp.asarray(bias, jnp.float32).reshape(1, 1)
    w = w_smem[0, 0]
    b = b_smem[0, 0]

    n = x.size
    flat = x.reshape(-1)

    # Small-input fast path: kernel launch + lane repack would dominate.
    if n < sub * LANES:
        out = (flat.astype(jnp.float32) * w + b).astype(out_dtype)
        return out.reshape(orig_shape)

    # Aligned prefix handled by the Pallas kernel (no pad copy).  The remainder
    # (< sub*128 elements) is handled by a fused plain-JAX epilogue below.
    rows_main = (n // (sub * LANES)) * sub
    n_main = rows_main * LANES

    tile_rows = min(tile_rows, rows_main)
    tile_rows = max((tile_rows // sub) * sub, sub)

    prefix = flat if n_main == n else flat[:n_main]
    x2d = prefix.reshape(rows_main, LANES)           # lane-dense (rows, 128) slab

    out2d = pl.pallas_call(
        linreg_kernel,
        out_shape=jax.ShapeDtypeStruct((rows_main, LANES), out_dtype),
        grid=(pl.cdiv(rows_main, tile_rows),),
        in_specs=[
            pl.BlockSpec(memory_space=pltpu.SMEM),               # weight scalar
            pl.BlockSpec(memory_space=pltpu.SMEM),               # bias scalar
            pl.BlockSpec((tile_rows, LANES), lambda i: (i, 0)),   # x tile
        ],
        out_specs=pl.BlockSpec((tile_rows, LANES), lambda i: (i, 0)),
        compiler_params=pltpu.CompilerParams(
            dimension_semantics=("parallel",),
        ),
    )(w_smem, b_smem, x2d)

    main_flat = out2d.reshape(-1)
    if n_main == n:
        return main_flat.reshape(orig_shape)

    # Tiny unaligned tail: plain-JAX epilogue (same math), then stitch back.
    tail_out = (flat[n_main:].astype(jnp.float32) * w + b).astype(out_dtype)
    return jnp.concatenate([main_flat, tail_out]).reshape(orig_shape)


if __name__ == "__main__":
    key = jax.random.PRNGKey(0)
    kx1, kx2, kx3, kw, kb = jax.random.split(key, 5)

    # nn.Linear(1, 1) parameters (PyTorch default init is U(-1, 1) for fan_in=1),
    # sampled deterministically from key 0.
    weight = jax.random.uniform(kw, (1, 1), jnp.float32, -1.0, 1.0)
    bias = jax.random.uniform(kb, (1,), jnp.float32, -1.0, 1.0)

    def ref_fn(xv):
        return (xv.astype(jnp.float32) @ weight.T + bias).astype(xv.dtype)

    # 1) Tiny batch (demo-sized): exercises the small-input fast path.
    x_small = jax.random.normal(kx1, (8, 1), jnp.float32)
    out_small = jax.block_until_ready(linear_regression_forward(x_small, weight, bias))
    assert out_small.shape == (8, 1) and out_small.dtype == jnp.float32
    assert jnp.allclose(out_small, ref_fn(x_small), atol=1e-6, rtol=1e-6)

    # 2) f32 batch with an unaligned tail: exercises the Pallas path + epilogue.
    x_f32 = jax.random.normal(kx2, (4133, 1), jnp.float32)
    out_f32 = jax.block_until_ready(linear_regression_forward(x_f32, weight, bias))
    assert out_f32.shape == (4133, 1) and out_f32.dtype == jnp.float32
    assert jnp.allclose(out_f32, ref_fn(x_f32), atol=1e-6, rtol=1e-6)

    # 3) bf16 batch, lane/sublane aligned: exercises the dtype-native Pallas path.
    x_bf16 = jax.random.normal(kx3, (2048, 1), jnp.float32).astype(jnp.bfloat16)
    out_bf16 = jax.block_until_ready(linear_regression_forward(x_bf16, weight, bias))
    assert out_bf16.shape == (2048, 1) and out_bf16.dtype == jnp.bfloat16
    assert jnp.allclose(out_bf16.astype(jnp.float32),
                        ref_fn(x_bf16).astype(jnp.float32), atol=3e-2, rtol=3e-2)

    # 4) Forced small tile -> grid with a partial last block (edge masking path).
    out_part = jax.block_until_ready(
        linear_regression_forward(x_f32, weight, bias, tile_rows=24))
    assert jnp.allclose(out_part, ref_fn(x_f32), atol=1e-6, rtol=1e-6)

    print("KERNEL_OK")
</pallas_src>

<mosaic_0001>
module attributes {stable_mosaic.version = 11 : i64} {
  func.func @linreg_kernel(%arg0: i32, %arg1: memref<1x1xf32, #tpu.memory_space<smem>>, %arg2: memref<1x1xf32, #tpu.memory_space<smem>>, %arg3: memref<32x128xf32, #tpu.memory_space<vmem>>, %arg4: memref<32x128xf32, #tpu.memory_space<vmem>>) attributes {dimension_semantics = [#tpu.dimension_semantics<parallel>], iteration_bounds = array<i64: 1>, scalar_prefetch = 0 : i64, scratch_operands = 0 : i64, tpu.core_type = #tpu.core_type<tc>, window_params = [{transform_indices = @transform_0, window_bounds = array<i64: 1, 1>}, {transform_indices = @transform_1, window_bounds = array<i64: 1, 1>}, {transform_indices = @transform_2, window_bounds = array<i64: 32, 128>}, {transform_indices = @transform_3, window_bounds = array<i64: 32, 128>}]} {
    %c0 = arith.constant 0 : index
    %c0_0 = arith.constant 0 : index
    %0 = memref.load %arg1[%c0, %c0_0] : memref<1x1xf32, #tpu.memory_space<smem>>
    %c0_1 = arith.constant 0 : index
    %c0_2 = arith.constant 0 : index
    %1 = memref.load %arg2[%c0_1, %c0_2] : memref<1x1xf32, #tpu.memory_space<smem>>
    %c0_3 = arith.constant 0 : index
    %c0_4 = arith.constant 0 : index
    %2 = vector.load %arg3[%c0_3, %c0_4] : memref<32x128xf32, #tpu.memory_space<vmem>>, vector<32x128xf32>
    %3 = vector.broadcast %0 : f32 to vector<32x128xf32>
    %4 = arith.mulf %2, %3 : vector<32x128xf32>
    %5 = vector.broadcast %1 : f32 to vector<32x128xf32>
    %6 = arith.addf %4, %5 : vector<32x128xf32>
    %c0_5 = arith.constant 0 : index
    %c0_6 = arith.constant 0 : index
    %7 = vector.load %arg4[%c0_5, %c0_6] : memref<32x128xf32, #tpu.memory_space<vmem>>, vector<32x128xf32>
    tpu.vector_store %arg4[%c0_5, %c0_6], %6 {strides = array<i32>} : memref<32x128xf32, #tpu.memory_space<vmem>>, vector<32x128xf32>,
    return
  }
  func.func @transform_0(%arg0: i32) -> (i32, i32) {
    %c0_i32 = arith.constant 0 : i32
    %c0_i32_0 = arith.constant 0 : i32
    %c0_i32_1 = arith.constant 0 : i32
    return %c0_i32, %c0_i32_0 : i32, i32
  }
  func.func @transform_1(%arg0: i32) -> (i32, i32) {
    %c0_i32 = arith.constant 0 : i32
    %c0_i32_0 = arith.constant 0 : i32
    %c0_i32_1 = arith.constant 0 : i32
    return %c0_i32, %c0_i32_0 : i32, i32
  }
  func.func @transform_2(%arg0: i32) -> (i32, i32) {
    %c0_i32 = arith.constant 0 : i32
    %c0_i32_0 = arith.constant 0 : i32
    return %arg0, %c0_i32 : i32, i32
  }
  func.func @transform_3(%arg0: i32) -> (i32, i32) {
    %c0_i32 = arith.constant 0 : i32
    %c0_i32_0 = arith.constant 0 : i32
    return %arg0, %c0_i32 : i32, i32
  }
}

</mosaic_0001>

<bundles_post_ra>
// kernel: tpu_custom_call.1
= control target key start
LH: loop header
LB: loop body
LE: loop exit
PB: predicated region body
PF: predicated region fallthrough
CT: control target
= control target key end

     0   :  { %10 = vsyncpa [#allocation5], 0  ;;  %s170_s0 = inlined_call_operand.<no memory space> [shape: f32[1,1], index: 0, kind: input, shape index: {}]   ;;  %s171_s1 = inlined_call_operand.<no memory space> [shape: f32[1,1], index: 1, kind: input, shape index: {}]   ;;  %s172_s2 = inlined_call_operand.hbm [shape: f32[32,128], index: 2, kind: input, shape index: {}]   ;;  %s173_s3 = inlined_call_operand.hbm [shape: f32[32,128], index: 3, kind: output, shape index: {}]  }
   0x1   :  { %11 = vsyncpa [#allocation6], 0  ;;  %s20_s14 = sshll.u32 %s172_s2, 4  ;;  %s128_s15 = smov [#allocation4]   ;;  %s21_s14 = int_to_ptr.hbm [resolvable:$true] %s20_s14 }
   0x2   :  { %s22_s16 = sshll.u32 %s128_s15, 4  ;;  %s129_s17 = smov 128   ;;  %s23_s16 = int_to_ptr.vmem [resolvable:$true] %s22_s16 }
   0x3   :  { %s130_s18 = smov 8  }
   0x4   :  { %28 = dma.hbm_to_vmem [thread:$0]  %s21_s14, 512, %s23_s16, [#allocation5], %s129_s17, %s129_s17, %s130_s18  }
   0x5   :  { %124 = dma.done.wait [#allocation5], 512  }
   0x6   :  { %125 = vsyncadd [#allocation5], 4294966784  ;;  %v39_v0 = vstv %s170_s0  ;;  %v35_v1 = vld [vmem:[#allocation4] sm:$0xff]  ;;  %v44_v2 = vstv %s171_s1  ;;  %v36_v3 = vld [vmem:[#allocation4 + $0x8] sm:$0xff]  ;;  %s131_s2 = smov [#allocation7]   ;;  %s59_s0 = sshll.u32 %s173_s3, 4  ;;  %s60_s0 = int_to_ptr.hbm [resolvable:$true] %s59_s0 }
   0x7   :  { %v37_v4 = vld [vmem:[#allocation4 + $0x10] sm:$0xff]  ;;  %v40_v5 = vmul.f32 %v39_v0, %v35_v1  ;;  %v41_v6 = vmul.f32 %v39_v0, %v36_v3  ;;  %v38_v8 = vld [vmem:[#allocation4 + $0x18] sm:$0xff]  ;;  %s57_s23 = sshll.u32 %s131_s2, 4  ;;  %s58_s23 = int_to_ptr.vmem [resolvable:$true] %s57_s23 }
   0x8   :  { %v42_v7 = vmul.f32 %v39_v0, %v37_v4  ;;  %v43_v9 = vmul.f32 %v39_v0, %v38_v8 }
   0x9   :  { %v45_v10 = vadd.f32 %v44_v2, %v40_v5  ;;  %v46_v11 = vadd.f32 %v44_v2, %v41_v6 }
   0xa   :  { %v47_v12 = vadd.f32 %v44_v2, %v42_v7  ;;  %v48_v13 = vadd.f32 %v44_v2, %v43_v9 }
   0xb   :  { %49 = vst [vmem:[#allocation7] sm:$0xff] %v45_v10 }
   0xc   :  { %50 = vst [vmem:[#allocation7 + $0x8] sm:$0xff] %v46_v11 }
   0xd   :  { %51 = vst [vmem:[#allocation7 + $0x10] sm:$0xff] %v47_v12 }
   0xe   :  { %52 = vst [vmem:[#allocation7 + $0x18] sm:$0xff] %v48_v13 }
   0xf   :  { %65 = dma.vmem_to_hbm [thread:$0]  %s58_s23, 512, %s60_s0, [#allocation6], %s129_s17, %s129_s17, %s130_s18  }
  0x10   :  { %126 = dma.done.wait [#allocation6], 512  }
  0x11   :  { %127 = vsyncadd [#allocation6], 4294966784 }
  0x12   :  { %70 = vsyncpa [#allocation5], 1 }
  0x13   :  { %71 = vsyncpa [#allocation6], 1 }

</bundles_post_ra>
